<compile_context>
chip_gen: v6e
topology: v6e:2x2x1
jax: 0.10.0
libtpu: 0.0.40
codegen_flags: <defaults>
</compile_context>

<pallas_src>
import jax
import jax.numpy as jnp
from jax.experimental import pallas as pl
from jax.experimental.pallas import tpu as pltpu

VOCAB = 64      # synthetic stand-in for len(vectorizer.vocabulary_)
EMB = 10        # nn.Embedding(len(vocab), 10)
NN_STRUCTURE = [(10, 100), (100, 1)]

LANE = 128
SUBLANE = 8


def modeler_kernel(words_ref, wft_ref, b1_ref, w2c_ref, b2_ref, out_ref):
    # words_ref: (S_pad, Bt) int32, batch along lanes, pad id = -1.
    words_t = words_ref[...]
    s_pad, bt = words_t.shape
    vp = wft_ref.shape[1]                                    # 128 (padded vocab)

    # Bag-of-words counts, transposed: counts_t[v, b] = #{s : words[b, s] == v}.
    # One (Vp, Bt) sublane-iota, then S broadcast compares (rows of words_t
    # broadcast over sublanes).  Pad id -1 and padded vocab rows never match.
    v_iota = jax.lax.broadcasted_iota(jnp.int32, (vp, bt), 0)
    counts_t = jnp.zeros((vp, bt), jnp.float32)
    for s in range(s_pad):                                   # static unroll, S_pad == 8
        counts_t = counts_t + (v_iota == words_t[s:s + 1, :]).astype(jnp.float32)

    # Hidden layer (batch-in-lanes): h^T = relu((E @ W1)^T @ counts^T + b1^T).
    h_t = jnp.dot(wft_ref[...], counts_t, preferred_element_type=jnp.float32)
    h_t = jnp.maximum(h_t + b1_ref[...], 0.0)                # (Hp, Bt)

    # Output layer: logit[b] = sum_k h^T[k, b] * w2[k, 0] + b2.
    # VPU multiply + sublane (XLU) reduce — no second MXU pass, no padded lanes.
    logits = jnp.sum(h_t * w2c_ref[...], axis=0, keepdims=True) + b2_ref[...]  # (1, Bt)

    # Sigmoid over exactly Bt real values; lane-dense unmasked store.
    out_ref[...] = jax.nn.sigmoid(logits).reshape(1, 1, bt)


def prepare_params(emb_table, w1, b1, w2, b2):
    """One-time weight prep: fold Embedding into Linear1, transpose, pad to 128.

    counts @ (E @ W1) == (counts @ E) @ W1 exactly in exact arithmetic (ReLU is
    applied after W1), so the embedding table folds into the first Linear.
    """
    V, E = emb_table.shape
    H = w1.shape[1]                                          # 100
    Vp = max(LANE, pl.cdiv(V, LANE) * LANE)
    Hp = max(LANE, pl.cdiv(H, LANE) * LANE)

    w_fused_t = jnp.zeros((Hp, Vp), jnp.float32).at[:H, :V].set(
        jnp.dot(emb_table, w1).T)                            # (E @ W1)^T, padded
    b1_c = jnp.zeros((Hp, 1), jnp.float32).at[:H, 0].set(b1.reshape(-1))
    w2_c = jnp.zeros((Hp, 1), jnp.float32).at[:H, 0].set(w2[:, 0])
    b2_c = b2.reshape(1, 1).astype(jnp.float32)
    return w_fused_t, b1_c, w2_c, b2_c


def _modeler_forward(words, w_fused_t, b1_c, w2_c, b2_c):
    B, S = words.shape
    Hp, Vp = w_fused_t.shape

    S_pad = pl.cdiv(S, SUBLANE) * SUBLANE

    # Batch tiling: B_TILE is a multiple of 128 (lane-packed output), capped at
    # 1024 rows; once B > 128 the grid has >= 2 steps so both v7x TensorCores
    # get work.  Per-tile VMEM (~3 MiB at B_TILE=1024) fits every generation.
    n128 = pl.cdiv(B, LANE)
    tile_groups = max(1, min(8, pl.cdiv(n128, 2)))
    B_TILE = tile_groups * LANE
    Bp = pl.cdiv(B, B_TILE) * B_TILE
    nb = Bp // B_TILE

    # Batch on lanes; pad both seq (to 8) and batch with id -1 -> zero counts.
    words_t = jnp.full((S_pad, Bp), -1, jnp.int32).at[:S, :B].set(words.T)

    out = pl.pallas_call(
        modeler_kernel,
        out_shape=jax.ShapeDtypeStruct((nb, 1, B_TILE), jnp.float32),
        grid=(nb,),
        in_specs=[
            pl.BlockSpec((S_pad, B_TILE), lambda i: (0, i)),  # words tile (batch on lanes)
            pl.BlockSpec((Hp, Vp), lambda i: (0, 0)),         # (E@W1)^T, resident
            pl.BlockSpec((Hp, 1), lambda i: (0, 0)),          # b1 column
            pl.BlockSpec((Hp, 1), lambda i: (0, 0)),          # W2 real column
            pl.BlockSpec((1, 1), lambda i: (0, 0)),           # b2
        ],
        out_specs=pl.BlockSpec((1, 1, B_TILE), lambda i: (i, 0, 0)),
        compiler_params=pltpu.CompilerParams(
            dimension_semantics=("parallel",)),
    )(words_t, w_fused_t, b1_c, w2_c, b2_c)

    # (nb, 1, B_TILE) -> (Bp,) -> real batch rows only, shaped like torch (B, 1).
    return out.reshape(Bp)[:B].reshape(B, 1)


modeler_forward = jax.jit(_modeler_forward)


def reference_forward(words, emb_table, w1, b1, w2, b2):
    x = jnp.sum(emb_table[words], axis=1)
    h = jax.nn.relu(x @ w1 + b1)
    return jax.nn.sigmoid(h @ w2 + b2)


if __name__ == "__main__":
    key = jax.random.PRNGKey(0)
    k_words, k_emb, k_w1, k_b1, k_w2, k_b2 = jax.random.split(key, 6)

    B, S = 8, 8                      # small batch of token-id sequences
    H_IN, H_OUT = NN_STRUCTURE[0]    # (10, 100)
    O_IN, O_OUT = NN_STRUCTURE[1]    # (100, 1)

    words = jax.random.randint(k_words, (B, S), 0, VOCAB, dtype=jnp.int32)
    emb_table = jax.random.normal(k_emb, (VOCAB, EMB), dtype=jnp.float32)
    w1 = jax.random.normal(k_w1, (H_IN, H_OUT), dtype=jnp.float32) * 0.1
    b1 = jax.random.normal(k_b1, (1, H_OUT), dtype=jnp.float32) * 0.1
    w2 = jax.random.normal(k_w2, (O_IN, O_OUT), dtype=jnp.float32) * 0.1
    b2 = jax.random.normal(k_b2, (1, O_OUT), dtype=jnp.float32) * 0.1

    # One-time weight prep (hoisted out of the per-call hot path).
    params = prepare_params(emb_table, w1, b1, w2, b2)

    out = modeler_forward(words, *params)
    out = jax.block_until_ready(out)
    ref = reference_forward(words, emb_table, w1, b1, w2, b2)
    assert out.shape == (B, 1), out.shape
    # Folding E@W1 and doing the output layer as mul+reduce reassociates f32 sums.
    assert jnp.allclose(out, ref, atol=1e-4, rtol=1e-4), (out, ref)

    # Exercise the multi-tile (grid > 1) path with padded batch rows as well.
    B2 = 200
    words2 = jax.random.randint(jax.random.PRNGKey(1), (B2, S), 0, VOCAB,
                                dtype=jnp.int32)
    out2 = jax.block_until_ready(modeler_forward(words2, *params))
    ref2 = reference_forward(words2, emb_table, w1, b1, w2, b2)
    assert out2.shape == (B2, 1), out2.shape
    assert jnp.allclose(out2, ref2, atol=1e-4, rtol=1e-4)

    print("KERNEL_OK")
</pallas_src>

<mosaic_0001>
module attributes {stable_mosaic.version = 11 : i64} {
  func.func @modeler_kernel(%arg0: i32, %arg1: memref<8x128xi32, #tpu.memory_space<vmem>>, %arg2: memref<128x128xf32, #tpu.memory_space<vmem>>, %arg3: memref<128x1xf32, #tpu.memory_space<vmem>>, %arg4: memref<128x1xf32, #tpu.memory_space<vmem>>, %arg5: memref<1x1xf32, #tpu.memory_space<vmem>>, %arg6: memref<1x1x128xf32, #tpu.memory_space<vmem>>) attributes {dimension_semantics = [#tpu.dimension_semantics<parallel>], iteration_bounds = array<i64: 1>, scalar_prefetch = 0 : i64, scratch_operands = 0 : i64, tpu.core_type = #tpu.core_type<tc>, window_params = [{transform_indices = @transform_0, window_bounds = array<i64: 8, 128>}, {pipeline_mode = #tpu.pipeline_mode<synchronous>, transform_indices = @transform_1, window_bounds = array<i64: 128, 128>}, {pipeline_mode = #tpu.pipeline_mode<synchronous>, transform_indices = @transform_2, window_bounds = array<i64: 128, 1>}, {pipeline_mode = #tpu.pipeline_mode<synchronous>, transform_indices = @transform_3, window_bounds = array<i64: 128, 1>}, {pipeline_mode = #tpu.pipeline_mode<synchronous>, transform_indices = @transform_4, window_bounds = array<i64: 1, 1>}, {transform_indices = @transform_5, window_bounds = array<i64: 1, 1, 128>}]} {
    %c0 = arith.constant 0 : index
    %c0_0 = arith.constant 0 : index
    %0 = vector.load %arg1[%c0, %c0_0] : memref<8x128xi32, #tpu.memory_space<vmem>>, vector<8x128xi32>
    %1 = tpu.iota {dimensions = array<i32: 0>} : vector<128x128xi32>
    %cst = arith.constant 0.000000e+00 : f32
    %2 = vector.broadcast %cst : f32 to vector<128x128xf32>
    %3 = vector.extract_strided_slice %0 {offsets = [0, 0], sizes = [1, 128], strides = [1, 1]} : vector<8x128xi32> to vector<1x128xi32>
    %4 = vector.broadcast %3 : vector<1x128xi32> to vector<128x128xi32>
    %5 = arith.cmpi eq, %1, %4 : vector<128x128xi32>
    %6 = arith.extui %5 : vector<128x128xi1> to vector<128x128xi32>
    %7 = arith.sitofp %6 : vector<128x128xi32> to vector<128x128xf32>
    %8 = arith.addf %2, %7 : vector<128x128xf32>
    %9 = vector.extract_strided_slice %0 {offsets = [1, 0], sizes = [1, 128], strides = [1, 1]} : vector<8x128xi32> to vector<1x128xi32>
    %10 = vector.broadcast %9 : vector<1x128xi32> to vector<128x128xi32>
    %11 = arith.cmpi eq, %1, %10 : vector<128x128xi32>
    %12 = arith.extui %11 : vector<128x128xi1> to vector<128x128xi32>
    %13 = arith.sitofp %12 : vector<128x128xi32> to vector<128x128xf32>
    %14 = arith.addf %8, %13 : vector<128x128xf32>
    %15 = vector.extract_strided_slice %0 {offsets = [2, 0], sizes = [1, 128], strides = [1, 1]} : vector<8x128xi32> to vector<1x128xi32>
    %16 = vector.broadcast %15 : vector<1x128xi32> to vector<128x128xi32>
    %17 = arith.cmpi eq, %1, %16 : vector<128x128xi32>
    %18 = arith.extui %17 : vector<128x128xi1> to vector<128x128xi32>
    %19 = arith.sitofp %18 : vector<128x128xi32> to vector<128x128xf32>
    %20 = arith.addf %14, %19 : vector<128x128xf32>
    %21 = vector.extract_strided_slice %0 {offsets = [3, 0], sizes = [1, 128], strides = [1, 1]} : vector<8x128xi32> to vector<1x128xi32>
    %22 = vector.broadcast %21 : vector<1x128xi32> to vector<128x128xi32>
    %23 = arith.cmpi eq, %1, %22 : vector<128x128xi32>
    %24 = arith.extui %23 : vector<128x128xi1> to vector<128x128xi32>
    %25 = arith.sitofp %24 : vector<128x128xi32> to vector<128x128xf32>
    %26 = arith.addf %20, %25 : vector<128x128xf32>
    %27 = vector.extract_strided_slice %0 {offsets = [4, 0], sizes = [1, 128], strides = [1, 1]} : vector<8x128xi32> to vector<1x128xi32>
    %28 = vector.broadcast %27 : vector<1x128xi32> to vector<128x128xi32>
    %29 = arith.cmpi eq, %1, %28 : vector<128x128xi32>
    %30 = arith.extui %29 : vector<128x128xi1> to vector<128x128xi32>
    %31 = arith.sitofp %30 : vector<128x128xi32> to vector<128x128xf32>
    %32 = arith.addf %26, %31 : vector<128x128xf32>
    %33 = vector.extract_strided_slice %0 {offsets = [5, 0], sizes = [1, 128], strides = [1, 1]} : vector<8x128xi32> to vector<1x128xi32>
    %34 = vector.broadcast %33 : vector<1x128xi32> to vector<128x128xi32>
    %35 = arith.cmpi eq, %1, %34 : vector<128x128xi32>
    %36 = arith.extui %35 : vector<128x128xi1> to vector<128x128xi32>
    %37 = arith.sitofp %36 : vector<128x128xi32> to vector<128x128xf32>
    %38 = arith.addf %32, %37 : vector<128x128xf32>
    %39 = vector.extract_strided_slice %0 {offsets = [6, 0], sizes = [1, 128], strides = [1, 1]} : vector<8x128xi32> to vector<1x128xi32>
    %40 = vector.broadcast %39 : vector<1x128xi32> to vector<128x128xi32>
    %41 = arith.cmpi eq, %1, %40 : vector<128x128xi32>
    %42 = arith.extui %41 : vector<128x128xi1> to vector<128x128xi32>
    %43 = arith.sitofp %42 : vector<128x128xi32> to vector<128x128xf32>
    %44 = arith.addf %38, %43 : vector<128x128xf32>
    %45 = vector.extract_strided_slice %0 {offsets = [7, 0], sizes = [1, 128], strides = [1, 1]} : vector<8x128xi32> to vector<1x128xi32>
    %46 = vector.broadcast %45 : vector<1x128xi32> to vector<128x128xi32>
    %47 = arith.cmpi eq, %1, %46 : vector<128x128xi32>
    %48 = arith.extui %47 : vector<128x128xi1> to vector<128x128xi32>
    %49 = arith.sitofp %48 : vector<128x128xi32> to vector<128x128xf32>
    %50 = arith.addf %44, %49 : vector<128x128xf32>
    %c0_1 = arith.constant 0 : index
    %c0_2 = arith.constant 0 : index
    %51 = vector.load %arg2[%c0_1, %c0_2] : memref<128x128xf32, #tpu.memory_space<vmem>>, vector<128x128xf32>
    %cst_3 = arith.constant dense<0.000000e+00> : vector<128x128xf32>
    %52 = tpu.matmul %51, %50, %cst_3 {dimension_numbers = #tpu.dot_dimension_numbers<[1], [0], [0], [1], [0, 0, 1, 1], [], []>} : vector<128x128xf32>, vector<128x128xf32>, vector<128x128xf32> -> vector<128x128xf32>
    %c0_4 = arith.constant 0 : index
    %c0_5 = arith.constant 0 : index
    %53 = vector.load %arg3[%c0_4, %c0_5] : memref<128x1xf32, #tpu.memory_space<vmem>>, vector<128x1xf32>
    %54 = vector.broadcast %53 : vector<128x1xf32> to vector<128x128xf32>
    %55 = arith.addf %52, %54 : vector<128x128xf32>
    %cst_6 = arith.constant 0.000000e+00 : f32
    %56 = vector.broadcast %cst_6 : f32 to vector<128x128xf32>
    %57 = arith.maximumf %55, %56 : vector<128x128xf32>
    %c0_7 = arith.constant 0 : index
    %c0_8 = arith.constant 0 : index
    %58 = vector.load %arg4[%c0_7, %c0_8] : memref<128x1xf32, #tpu.memory_space<vmem>>, vector<128x1xf32>
    %59 = vector.broadcast %58 : vector<128x1xf32> to vector<128x128xf32>
    %60 = arith.mulf %57, %59 : vector<128x128xf32>
    %cst_9 = arith.constant dense<0.000000e+00> : vector<128xf32>
    %61 = vector.multi_reduction <add>, %60, %cst_9 [0] : vector<128x128xf32> to vector<128xf32>
    %62 = vector.shape_cast %61 : vector<128xf32> to vector<1x128xf32>
    %c0_10 = arith.constant 0 : index
    %c0_11 = arith.constant 0 : index
    %63 = vector.load %arg5[%c0_10, %c0_11] : memref<1x1xf32, #tpu.memory_space<vmem>>, vector<1x1xf32>
    %64 = vector.broadcast %63 : vector<1x1xf32> to vector<1x128xf32>
    %65 = arith.addf %62, %64 : vector<1x128xf32>
    %66 = arith.negf %65 : vector<1x128xf32>
    %67 = math.exp %66 : vector<1x128xf32>
    %cst_12 = arith.constant 1.000000e+00 : f32
    %68 = vector.broadcast %cst_12 : f32 to vector<1x128xf32>
    %69 = arith.addf %68, %67 : vector<1x128xf32>
    %70 = arith.divf %68, %69 : vector<1x128xf32>
    %71 = vector.shape_cast %70 : vector<1x128xf32> to vector<1x1x128xf32>
    %c0_13 = arith.constant 0 : index
    %c0_14 = arith.constant 0 : index
    %c0_15 = arith.constant 0 : index
    %72 = vector.load %arg6[%c0_13, %c0_14, %c0_15] : memref<1x1x128xf32, #tpu.memory_space<vmem>>, vector<1x1x128xf32>
    tpu.vector_store %arg6[%c0_13, %c0_14, %c0_15], %71 {strides = array<i32>} : memref<1x1x128xf32, #tpu.memory_space<vmem>>, vector<1x1x128xf32>,
    return
  }
  func.func @transform_0(%arg0: i32) -> (i32, i32) {
    %c0_i32 = arith.constant 0 : i32
    %c0_i32_0 = arith.constant 0 : i32
    return %c0_i32, %arg0 : i32, i32
  }
  func.func @transform_1(%arg0: i32) -> (i32, i32) {
    %c0_i32 = arith.constant 0 : i32
    %c0_i32_0 = arith.constant 0 : i32
    %c0_i32_1 = arith.constant 0 : i32
    return %c0_i32, %c0_i32_0 : i32, i32
  }
  func.func @transform_2(%arg0: i32) -> (i32, i32) {
    %c0_i32 = arith.constant 0 : i32
    %c0_i32_0 = arith.constant 0 : i32
    %c0_i32_1 = arith.constant 0 : i32
    return %c0_i32, %c0_i32_0 : i32, i32
  }
  func.func @transform_3(%arg0: i32) -> (i32, i32) {
    %c0_i32 = arith.constant 0 : i32
    %c0_i32_0 = arith.constant 0 : i32
    %c0_i32_1 = arith.constant 0 : i32
    return %c0_i32, %c0_i32_0 : i32, i32
  }
  func.func @transform_4(%arg0: i32) -> (i32, i32) {
    %c0_i32 = arith.constant 0 : i32
    %c0_i32_0 = arith.constant 0 : i32
    %c0_i32_1 = arith.constant 0 : i32
    return %c0_i32, %c0_i32_0 : i32, i32
  }
  func.func @transform_5(%arg0: i32) -> (i32, i32, i32) {
    %c0_i32 = arith.constant 0 : i32
    %c0_i32_0 = arith.constant 0 : i32
    %c0_i32_1 = arith.constant 0 : i32
    return %arg0, %c0_i32, %c0_i32_0 : i32, i32, i32
  }
}

</mosaic_0001>

<bundles_post_ra>
// kernel: _modeler_forward.1
= control target key start
LH: loop header
LB: loop body
LE: loop exit
PB: predicated region body
PF: predicated region fallthrough
CT: control target
= control target key end

     0   :  { %v23_v0 = vlaneseq  ;;  %v1269_v1 = vmov 0   ;;  %v1270_v30 = vmov 0.0   ;;  %s1966_s0 = inlined_call_operand.vmem [shape: s32[8,128], index: 0, kind: input, shape index: {}]   ;;  %s1967_s2 = inlined_call_operand.vmem [shape: f32[128,1], index: 2, kind: input, shape index: {}]   ;;  %s1968_s4 = inlined_call_operand.<no memory space> [shape: f32[1,1], index: 4, kind: input, shape index: {}]   ;;  %s1969_s1 = inlined_call_operand.vmem [shape: f32[128,128], index: 1, kind: input, shape index: {}]   ;;  %s1970_s3 = inlined_call_operand.vmem [shape: f32[128,1], index: 3, kind: input, shape index: {}]   ;;  %s1971_s5 = inlined_call_operand.vmem [shape: f32[1,1,128], index: 5, kind: output, shape index: {}]  }
   0x1   :  { %1263 = vset.pattern.permute.xlu0 %v1269_v1  ;;  %v600_v2 = vld [vmem:[%s1967_s2] sm:$0xff]  ;;  %1264 = vset.pattern.permute.xlu1 %v1269_v1  ;;  %v10_v3 = vstv %s1968_s4  ;;  %v602_v5 = vld [vmem:[%s1967_s2 + $0x10] sm:$0xff]  ;;  %v601_v7 = vld [vmem:[%s1967_s2 + $0x8] sm:$0xff] }
   0x2   :  { %v1307_v4 = vshrl.u32 %v23_v0, 7  ;;  %618 = vperm.xlu0 %1263, %v600_v2   ;;  %11 = vst [vmem:[#allocation2] sm:$0x1] %v10_v3  ;;  %v22_v6 = vld [vmem:[%s1966_s0] sm:$0xff]  ;;  %628 = vperm.xlu1 %1264, %v602_v5   ;;  %v603_v12 = vld [vmem:[%s1967_s2 + $0x18] sm:$0xff]  ;;  %v858_v29 = vld [vmem:[%s1970_s3 + $0x8] sm:$0xff] }
   0x3   :  { %v584_v17 = vld [vmem:[%s1969_s1] sm:$0xff]  ;;  %v859_v41 = vld [vmem:[%s1970_s3 + $0x10] sm:$0xff]  ;;  %v605_v50 = vld [vmem:[%s1967_s2 + $0x28] sm:$0xff] }
   0x4   :  { %v39_v8 = vadd.s32 120, %v1307_v4  ;;  %v42_v9 = vsub.s32 0, %v1307_v4  ;;  %v110_v10 = vsub.s32 1, %v1307_v4  ;;  %v178_v11 = vsub.s32 2, %v1307_v4  ;;  %v592_v18 = vld [vmem:[%s1969_s1 + $0x40] sm:$0xff]  ;;  %1205 = vmatprep.mubr.f32.mxu0 %v584_v17  ;;  %v860_v54 = vld [vmem:[%s1970_s3 + $0x18] sm:$0xff] }
   0x5   :  { %v246_v13 = vsub.s32 3, %v1307_v4  ;;  %v314_v14 = vsub.s32 4, %v1307_v4  ;;  %v382_v15 = vsub.s32 5, %v1307_v4  ;;  %v450_v16 = vsub.s32 6, %v1307_v4  ;;  %v857_v27 = vld [vmem:[%s1970_s3] sm:$0xff]  ;;  %1217 = vmatprep.mubr.f32.mxu1 %v592_v18  ;;  %v606_v61 = vld [vmem:[%s1967_s2 + $0x30] sm:$0xff] }
   0x6   :  { %v1337_v19 = vrot.slane %v22_v6, %v42_v9  ;;  %v1339_v20 = vrot.slane %v22_v6, %v110_v10  ;;  %v1341_v21 = vrot.slane %v22_v6, %v178_v11  ;;  %v518_v22 = vsub.s32 7, %v1307_v4  ;;  %623 = vperm.xlu0 %1263, %v601_v7   ;;  %633 = vperm.xlu1 %1264, %v603_v12   ;;  %v604_v36 = vld [vmem:[%s1967_s2 + $0x20] sm:$0xff]  ;;  %v862_v17 = vld [vmem:[%s1970_s3 + $0x28] sm:$0xff] }
   0x7   :  { %v1344_v23 = vrot.slane %v22_v6, %v246_v13  ;;  %v1346_v24 = vrot.slane %v22_v6, %v314_v14  ;;  %v1348_v25 = vrot.slane %v22_v6, %v382_v15  ;;  %v1350_v26 = vrot.slane %v22_v6, %v450_v16  ;;  %v861_v2 = vld [vmem:[%s1970_s3 + $0x20] sm:$0xff]  ;;  %v607_v13 = vld [vmem:[%s1967_s2 + $0x38] sm:$0xff] }
   0x8   :  { %vm59_vm0 = vcmp.eq.s32.totalorder %v39_v8, %v1337_v19  ;;  %vm127_vm1 = vcmp.eq.s32.totalorder %v39_v8, %v1339_v20  ;;  %vm195_vm2 = vcmp.eq.s32.totalorder %v39_v8, %v1341_v21  ;;  %v1358_v28 = vrot.slane %v22_v6, %v518_v22 }
   0x9   :  { %v1027_v31 = vsel %vm59_vm0, 1.0, %v1270_v30  ;;  %v1043_v32 = vsel %vm127_vm1, 1.0, %v1270_v30  ;;  %v1059_v33 = vsel %vm195_vm2, 1.0, %v1270_v30  ;;  %vm263_vm3 = vcmp.eq.s32.totalorder %v39_v8, %v1344_v23 }
   0xa   :  { %v175_v34 = vadd.f32 %v1043_v32, %v1027_v31  ;;  %vm331_vm4 = vcmp.eq.s32.totalorder %v39_v8, %v1346_v24  ;;  %vm399_vm5 = vcmp.eq.s32.totalorder %v39_v8, %v1348_v25  ;;  %875 = vperm.xlu0 %1263, %v857_v27   ;;  %v1075_v35 = vsel %vm263_vm3, 1.0, %v1270_v30  ;;  %880 = vperm.xlu1 %1264, %v858_v29  }
   0xb   :  { %vm467_vm6 = vcmp.eq.s32.totalorder %v39_v8, %v1350_v26  ;;  %vm535_vm7 = vcmp.eq.s32.totalorder %v39_v8, %v1358_v28  ;;  %v1091_v38 = vsel %vm331_vm4, 1.0, %v1270_v30  ;;  %v1107_v39 = vsel %vm399_vm5, 1.0, %v1270_v30 }
   0xc   :  { %v243_v37 = vadd.f32 %v1059_v33, %v175_v34  ;;  %v38_v40 = vadd.s32 112, %v1307_v4  ;;  %v1123_v42 = vsel %vm467_vm6, 1.0, %v1270_v30  ;;  %v1139_v43 = vsel %vm535_vm7, 1.0, %v1270_v30 }
   0xd   :  { %v1384_v44 = vadd.s32 104, %v1307_v4  ;;  %v1387_v45 = vadd.s32 96, %v1307_v4  ;;  %v1401_v53 = vadd.s32 88, %v1307_v4  ;;  %v1410_v57 = vadd.s32 80, %v1307_v4 }
   0xe   :  { %v311_v46 = vadd.f32 %v1075_v35, %v243_v37  ;;  %vm58_vm8 = vcmp.eq.s32.totalorder %v38_v40, %v1337_v19  ;;  %vm126_vm9 = vcmp.eq.s32.totalorder %v38_v40, %v1339_v20  ;;  %vm194_vm10 = vcmp.eq.s32.totalorder %v38_v40, %v1341_v21  ;;  %638 = vperm.xlu0 %1263, %v604_v36  }
   0xf   :  { %v1026_v47 = vsel %vm58_vm8, 1.0, %v1270_v30  ;;  %v1042_v48 = vsel %vm126_vm9, 1.0, %v1270_v30  ;;  %v1058_v49 = vsel %vm194_vm10, 1.0, %v1270_v30  ;;  %vm262_vm11 = vcmp.eq.s32.totalorder %v38_v40, %v1344_v23  ;;  %885 = vperm.xlu1 %1264, %v859_v41   ;;  %v608_v41 = vld [vmem:[%s1967_s2 + $0x40] sm:$0xff] }
  0x10   :  { %v379_v51 = vadd.f32 %v1091_v38, %v311_v46  ;;  %v174_v52 = vadd.f32 %v1042_v48, %v1026_v47  ;;  %vm330_vm12 = vcmp.eq.s32.totalorder %v38_v40, %v1346_v24  ;;  %v1074_v55 = vsel %vm262_vm11, 1.0, %v1270_v30 }
  0x11   :  { %v1090_v56 = vsel %vm330_vm12, 1.0, %v1270_v30  ;;  %vm398_vm13 = vcmp.eq.s32.totalorder %v38_v40, %v1348_v25  ;;  %vm466_vm14 = vcmp.eq.s32.totalorder %v38_v40, %v1350_v26  ;;  %vm534_vm15 = vcmp.eq.s32.totalorder %v38_v40, %v1358_v28 }
  0x12   :  { %v447_v58 = vadd.f32 %v1107_v39, %v379_v51  ;;  %v242_v59 = vadd.f32 %v1058_v49, %v174_v52  ;;  %643 = vperm.xlu0 %1263, %v605_v50   ;;  %v1106_v60 = vsel %vm398_vm13, 1.0, %v1270_v30  ;;  %vm57_vm0 = vcmp.eq.s32.totalorder %v1384_v44, %v1337_v19 }
  0x13   :  { %vm125_vm1 = vcmp.eq.s32.totalorder %v1384_v44, %v1339_v20  ;;  %vm193_vm2 = vcmp.eq.s32.totalorder %v1384_v44, %v1341_v21  ;;  %890 = vperm.xlu1 %1264, %v860_v54   ;;  %v1025_v0 = vsel %vm57_vm0, 1.0, %v1270_v30  ;;  %vm261_vm3 = vcmp.eq.s32.totalorder %v1384_v44, %v1344_v23 }
  0x14   :  { %v515_v62 = vadd.f32 %v1123_v42, %v447_v58  ;;  %v310_v63 = vadd.f32 %v1074_v55, %v242_v59  ;;  %v1041_v1 = vsel %vm125_vm1, 1.0, %v1270_v30  ;;  %v1057_v5 = vsel %vm193_vm2, 1.0, %v1270_v30  ;;  %v863_v42 = vld [vmem:[%s1970_s3 + $0x30] sm:$0xff]  ;;  %v609_v58 = vld [vmem:[%s1967_s2 + $0x48] sm:$0xff]  ;;  %v864_v59 = vld [vmem:[%s1970_s3 + $0x38] sm:$0xff] }
  0x15   :  { %v173_v3 = vadd.f32 %v1041_v1, %v1025_v0  ;;  %vm329_vm4 = vcmp.eq.s32.totalorder %v1384_v44, %v1346_v24  ;;  %v1122_v8 = vsel %vm466_vm14, 1.0, %v1270_v30  ;;  %v1073_v10 = vsel %vm261_vm3, 1.0, %v1270_v30 }
  0x16   :  { %v583_v6 = vadd.f32 %v1139_v43, %v515_v62  ;;  %v378_v7 = vadd.f32 %v1090_v56, %v310_v63  ;;  %648 = vperm.xlu0 %1263, %v606_v61   ;;  %v1138_v11 = vsel %vm534_vm15, 1.0, %v1270_v30  ;;  %vm397_vm5 = vcmp.eq.s32.totalorder %v1384_v44, %v1348_v25 }
  0x17   :  { %v241_v12 = vadd.f32 %v1057_v5, %v173_v3  ;;  %vm465_vm6 = vcmp.eq.s32.totalorder %v1384_v44, %v1350_v26  ;;  %895 = vperm.xlu1 %1264, %v861_v2   ;;  %v1089_v15 = vsel %vm329_vm4, 1.0, %v1270_v30  ;;  %v1105_v16 = vsel %vm397_vm5, 1.0, %v1270_v30 }
  0x18   :  { %1173 = vmatprep.subr.mxu0 %v583_v6  ;;  %1229 = vmatprep.subr.mxu1 %v583_v6  ;;  %v446_v14 = vadd.f32 %v1106_v60, %v378_v7  ;;  %vm533_vm7 = vcmp.eq.s32.totalorder %v1384_v44, %v1358_v28  ;;  %v1121_v22 = vsel %vm465_vm6, 1.0, %v1270_v30  ;;  %vm56_vm8 = vcmp.eq.s32.totalorder %v1387_v45, %v1337_v19 }
  0x19   :  { %1174 = vmatpush3.msra.mxu0 %v583_v6  ;;  %1245 = vmatpush3.msra.mxu1 %v583_v6  ;;  %v309_v18 = vadd.f32 %v1073_v10, %v241_v12  ;;  %vm124_vm9 = vcmp.eq.s32.totalorder %v1387_v45, %v1339_v20  ;;  %v1024_v29 = vsel %vm56_vm8, 1.0, %v1270_v30  ;;  %vm192_vm10 = vcmp.eq.s32.totalorder %v1387_v45, %v1341_v21  ;;  %v610_v12 = vld [vmem:[%s1967_s2 + $0x50] sm:$0xff] }
  0x1a   :  { %v514_v27 = vadd.f32 %v1122_v8, %v446_v14  ;;  %v1040_v31 = vsel %vm124_vm9, 1.0, %v1270_v30  ;;  %653 = vperm.xlu0 %1263, %v607_v13   ;;  %v1056_v34 = vsel %vm192_vm10, 1.0, %v1270_v30  ;;  %vm260_vm11 = vcmp.eq.s32.totalorder %v1387_v45, %v1344_v23  ;;  %v865_v13 = vld [vmem:[%s1970_s3 + $0x40] sm:$0xff] }
  0x1b   :  { %v377_v32 = vadd.f32 %v1089_v15, %v309_v18  ;;  %v172_v33 = vadd.f32 %v1040_v31, %v1024_v29  ;;  %900 = vperm.xlu1 %1264, %v862_v17   ;;  %v1072_v36 = vsel %vm260_vm11, 1.0, %v1270_v30  ;;  %vm328_vm12 = vcmp.eq.s32.totalorder %v1387_v45, %v1346_v24 }
  0x1c   :  { %v582_v35 = vadd.f32 %v1138_v11, %v514_v27  ;;  %vm396_vm13 = vcmp.eq.s32.totalorder %v1387_v45, %v1348_v25  ;;  %v1137_v38 = vsel %vm533_vm7, 1.0, %v1270_v30  ;;  %v1477_v40 = vadd.s32 72, %v1307_v4 }
  0x1d   :  { %v445_v37 = vadd.f32 %v1105_v16, %v377_v32  ;;  %v240_v39 = vadd.f32 %v1056_v34, %v172_v33  ;;  %v1088_v43 = vsel %vm328_vm12, 1.0, %v1270_v30  ;;  %v1104_v46 = vsel %vm396_vm13, 1.0, %v1270_v30  ;;  %v611_v33 = vld [vmem:[%s1967_s2 + $0x58] sm:$0xff]  ;;  %v866_v34 = vld [vmem:[%s1970_s3 + $0x48] sm:$0xff] }
  0x1e   :  { %1175 = vmatprep.subr.mxu0 %v582_v35  ;;  %1230 = vmatprep.subr.mxu1 %v582_v35  ;;  %vm464_vm14 = vcmp.eq.s32.totalorder %v1387_v45, %v1350_v26  ;;  %vm55_vm15 = vcmp.eq.s32.totalorder %v1401_v53, %v1337_v19  ;;  %vm532_vm0 = vcmp.eq.s32.totalorder %v1387_v45, %v1358_v28  ;;  %v1494_v48 = vadd.s32 64, %v1307_v4 }
  0x1f   :  { %1176 = vmatpush3.msra.mxu0 %v582_v35  ;;  %1246 = vmatpush3.msra.mxu1 %v582_v35  ;;  %v513_v44 = vadd.f32 %v1121_v22, %v445_v37  ;;  %v308_v47 = vadd.f32 %v1072_v36, %v240_v39  ;;  %v1023_v49 = vsel %vm55_vm15, 1.0, %v1270_v30  ;;  %vm123_vm1 = vcmp.eq.s32.totalorder %v1401_v53, %v1339_v20 }
  0x20   :  { %vm191_vm2 = vcmp.eq.s32.totalorder %v1401_v53, %v1341_v21  ;;  %vm259_vm3 = vcmp.eq.s32.totalorder %v1401_v53, %v1344_v23  ;;  %658 = vperm.xlu0 %1263, %v608_v41   ;;  %905 = vperm.xlu1 %1264, %v863_v42   ;;  %v1039_v52 = vsel %vm123_vm1, 1.0, %v1270_v30  ;;  %v1120_v55 = vsel %vm464_vm14, 1.0, %v1270_v30 }
  0x21   :  { %v581_v50 = vadd.f32 %v1137_v38, %v513_v44  ;;  %v376_v51 = vadd.f32 %v1088_v43, %v308_v47  ;;  %v1055_v54 = vsel %vm191_vm2, 1.0, %v1270_v30  ;;  %v171_v56 = vadd.f32 %v1039_v52, %v1023_v49  ;;  %v867_v49 = vld [vmem:[%s1970_s3 + $0x50] sm:$0xff] }
  0x22   :  { %vm327_vm4 = vcmp.eq.s32.totalorder %v1401_v53, %v1346_v24  ;;  %vm395_vm5 = vcmp.eq.s32.totalorder %v1401_v53, %v1348_v25  ;;  %v1136_v61 = vsel %vm532_vm0, 1.0, %v1270_v30  ;;  %v1071_v62 = vsel %vm259_vm3, 1.0, %v1270_v30 }
  0x23   :  { %1177 = vmatprep.subr.mxu0 %v581_v50  ;;  %1231 = vmatprep.subr.mxu1 %v581_v50  ;;  %v444_v60 = vadd.f32 %v1104_v46, %v376_v51  ;;  %v1087_v63 = vsel %vm327_vm4, 1.0, %v1270_v30  ;;  %v239_v0 = vadd.f32 %v1055_v54, %v171_v56  ;;  %v1103_v1 = vsel %vm395_vm5, 1.0, %v1270_v30 }
  0x24   :  { %1178 = vmatpush3.msra.mxu0 %v581_v50  ;;  %1247 = vmatpush3.msra.mxu1 %v581_v50  ;;  %vm463_vm6 = vcmp.eq.s32.totalorder %v1401_v53, %v1350_v26  ;;  %vm54_vm7 = vcmp.eq.s32.totalorder %v1410_v57, %v1337_v19  ;;  %vm531_vm8 = vcmp.eq.s32.totalorder %v1401_v53, %v1358_v28  ;;  %v1588_v38 = vadd.s32 56, %v1307_v4 }
  0x25   :  { %v512_v45 = vadd.f32 %v1120_v55, %v444_v60  ;;  %v1022_v2 = vsel %vm54_vm7, 1.0, %v1270_v30  ;;  %vm122_vm9 = vcmp.eq.s32.totalorder %v1410_v57, %v1339_v20  ;;  %663 = vperm.xlu0 %1263, %v609_v58   ;;  %910 = vperm.xlu1 %1264, %v864_v59   ;;  %v307_v3 = vadd.f32 %v1071_v62, %v239_v0  ;;  %v868_v0 = vld [vmem:[%s1970_s3 + $0x58] sm:$0xff] }
  0x26   :  { %v1038_v5 = vsel %vm122_vm9, 1.0, %v1270_v30  ;;  %vm190_vm10 = vcmp.eq.s32.totalorder %v1410_v57, %v1341_v21  ;;  %vm258_vm11 = vcmp.eq.s32.totalorder %v1410_v57, %v1344_v23  ;;  %vm326_vm12 = vcmp.eq.s32.totalorder %v1410_v57, %v1346_v24 }
  0x27   :  { %v580_v6 = vadd.f32 %v1136_v61, %v512_v45  ;;  %v170_v7 = vadd.f32 %v1038_v5, %v1022_v2  ;;  %v1054_v8 = vsel %vm190_vm10, 1.0, %v1270_v30  ;;  %v1070_v10 = vsel %vm258_vm11, 1.0, %v1270_v30 }
  0x28   :  { %v375_v11 = vadd.f32 %v1087_v63, %v307_v3  ;;  %vm394_vm13 = vcmp.eq.s32.totalorder %v1410_v57, %v1348_v25  ;;  %vm462_vm14 = vcmp.eq.s32.totalorder %v1410_v57, %v1350_v26  ;;  %v1119_v14 = vsel %vm463_vm6, 1.0, %v1270_v30  ;;  %v613_v63 = vld [vmem:[%s1967_s2 + $0x68] sm:$0xff] }
  0x29   :  { %1179 = vmatprep.subr.mxu0 %v580_v6  ;;  %1232 = vmatprep.subr.mxu1 %v580_v6  ;;  %v1135_v15 = vsel %vm531_vm8, 1.0, %v1270_v30  ;;  %v238_v16 = vadd.f32 %v1054_v8, %v170_v7  ;;  %v1086_v17 = vsel %vm326_vm12, 1.0, %v1270_v30  ;;  %v1102_v22 = vsel %vm394_vm13, 1.0, %v1270_v30 }
  0x2a   :  { %1180 = vmatpush3.msra.mxu0 %v580_v6  ;;  %1248 = vmatpush3.msra.mxu1 %v580_v6  ;;  %v443_v18 = vadd.f32 %v1103_v1, %v375_v11  ;;  %v1118_v27 = vsel %vm462_vm14, 1.0, %v1270_v30  ;;  %vm53_vm15 = vcmp.eq.s32.totalorder %v1477_v40, %v1337_v19  ;;  %vm530_vm0 = vcmp.eq.s32.totalorder %v1410_v57, %v1358_v28  ;;  %v612_v57 = vld [vmem:[%s1967_s2 + $0x60] sm:$0xff] }
  0x2b   :  { %v306_v29 = vadd.f32 %v1070_v10, %v238_v16  ;;  %v1021_v53 = vsel %vm53_vm15, 1.0, %v1270_v30  ;;  %vm121_vm1 = vcmp.eq.s32.totalorder %v1477_v40, %v1339_v20  ;;  %668 = vperm.xlu0 %1263, %v610_v12   ;;  %915 = vperm.xlu1 %1264, %v865_v13   ;;  %vm189_vm2 = vcmp.eq.s32.totalorder %v1477_v40, %v1341_v21 }
  0x2c   :  { %v511_v31 = vadd.f32 %v1119_v14, %v443_v18  ;;  %v1037_v32 = vsel %vm121_vm1, 1.0, %v1270_v30  ;;  %vm257_vm3 = vcmp.eq.s32.totalorder %v1477_v40, %v1344_v23  ;;  %v1053_v37 = vsel %vm189_vm2, 1.0, %v1270_v30  ;;  %v869_v18 = vld [vmem:[%s1970_s3 + $0x60] sm:$0xff] }
  0x2d   :  { %v374_v35 = vadd.f32 %v1086_v17, %v306_v29  ;;  %v169_v36 = vadd.f32 %v1037_v32, %v1021_v53  ;;  %v1069_v41 = vsel %vm257_vm3, 1.0, %v1270_v30  ;;  %vm325_vm4 = vcmp.eq.s32.totalorder %v1477_v40, %v1346_v24  ;;  %v614_v17 = vld [vmem:[%s1967_s2 + $0x70] sm:$0xff] }
  0x2e   :  { %v579_v39 = vadd.f32 %v1135_v15, %v511_v31  ;;  %vm393_vm5 = vcmp.eq.s32.totalorder %v1477_v40, %v1348_v25  ;;  %v1134_v43 = vsel %vm530_vm0, 1.0, %v1270_v30  ;;  %vm461_vm6 = vcmp.eq.s32.totalorder %v1477_v40, %v1350_v26 }
  0x2f   :  { %v442_v42 = vadd.f32 %v1102_v22, %v374_v35  ;;  %v237_v46 = vadd.f32 %v1053_v37, %v169_v36  ;;  %673 = vperm.xlu0 %1263, %v611_v33   ;;  %920 = vperm.xlu1 %1264, %v866_v34   ;;  %v1085_v44 = vsel %vm325_vm4, 1.0, %v1270_v30  ;;  %v1101_v47 = vsel %vm393_vm5, 1.0, %v1270_v30 }
  0x30   :  { %1181 = vmatprep.subr.mxu0 %v579_v39  ;;  %1233 = vmatprep.subr.mxu1 %v579_v39  ;;  %vm52_vm7 = vcmp.eq.s32.totalorder %v1494_v48, %v1337_v19  ;;  %vm120_vm8 = vcmp.eq.s32.totalorder %v1494_v48, %v1339_v20  ;;  %vm529_vm9 = vcmp.eq.s32.totalorder %v1477_v40, %v1358_v28  ;;  %v1117_v60 = vsel %vm461_vm6, 1.0, %v1270_v30 }
  0x31   :  { %1182 = vmatpush3.msra.mxu0 %v579_v39  ;;  %1249 = vmatpush3.msra.mxu1 %v579_v39  ;;  %v510_v50 = vadd.f32 %v1118_v27, %v442_v42  ;;  %v305_v51 = vadd.f32 %v1069_v41, %v237_v46  ;;  %v1020_v52 = vsel %vm52_vm7, 1.0, %v1270_v30  ;;  %v1036_v54 = vsel %vm120_vm8, 1.0, %v1270_v30  ;;  %v615_v46 = vld [vmem:[%s1967_s2 + $0x78] sm:$0xff] }
  0x32   :  { %vm188_vm10 = vcmp.eq.s32.totalorder %v1494_v48, %v1341_v21  ;;  %vm256_vm11 = vcmp.eq.s32.totalorder %v1494_v48, %v1344_v23  ;;  %vm324_vm12 = vcmp.eq.s32.totalorder %v1494_v48, %v1346_v24  ;;  %v168_v58 = vadd.f32 %v1036_v54, %v1020_v52 }
  0x33   :  { %v578_v55 = vadd.f32 %v1134_v43, %v510_v50  ;;  %v373_v56 = vadd.f32 %v1085_v44, %v305_v51  ;;  %v1052_v59 = vsel %vm188_vm10, 1.0, %v1270_v30  ;;  %678 = vperm.xlu0 %1263, %v612_v57   ;;  %925 = vperm.xlu1 %1264, %v867_v49   ;;  %v1133_v61 = vsel %vm529_vm9, 1.0, %v1270_v30  ;;  %v870_v44 = vld [vmem:[%s1970_s3 + $0x68] sm:$0xff] }
  0x34   :  { %v1068_v62 = vsel %vm256_vm11, 1.0, %v1270_v30  ;;  %vm392_vm13 = vcmp.eq.s32.totalorder %v1494_v48, %v1348_v25  ;;  %v236_v40 = vadd.f32 %v1052_v59, %v168_v58  ;;  %v1084_v45 = vsel %vm324_vm12, 1.0, %v1270_v30 }
  0x35   :  { %1183 = vmatprep.subr.mxu0 %v578_v55  ;;  %1234 = vmatprep.subr.mxu1 %v578_v55  ;;  %v441_v1 = vadd.f32 %v1101_v47, %v373_v56  ;;  %vm460_vm14 = vcmp.eq.s32.totalorder %v1494_v48, %v1350_v26  ;;  %v1100_v2 = vsel %vm392_vm13, 1.0, %v1270_v30  ;;  %vm528_vm15 = vcmp.eq.s32.totalorder %v1494_v48, %v1358_v28 }
  0x36   :  { %1184 = vmatpush3.msra.mxu0 %v578_v55  ;;  %1250 = vmatpush3.msra.mxu1 %v578_v55  ;;  %vm51_vm0 = vcmp.eq.s32.totalorder %v1588_v38, %v1337_v19  ;;  %vm119_vm1 = vcmp.eq.s32.totalorder %v1588_v38, %v1339_v20  ;;  %v304_v5 = vadd.f32 %v1068_v62, %v236_v40  ;;  %v1653_v7 = vadd.s32 48, %v1307_v4 }
  0x37   :  { %v509_v3 = vadd.f32 %v1117_v60, %v441_v1  ;;  %v1019_v6 = vsel %vm51_vm0, 1.0, %v1270_v30  ;;  %683 = vperm.xlu0 %1263, %v613_v63   ;;  %930 = vperm.xlu1 %1264, %v868_v0   ;;  %v1035_v8 = vsel %vm119_vm1, 1.0, %v1270_v30  ;;  %vm187_vm2 = vcmp.eq.s32.totalorder %v1588_v38, %v1341_v21  ;;  %v871_v0 = vld [vmem:[%s1970_s3 + $0x70] sm:$0xff]  ;;  %v872_v1 = vld [vmem:[%s1970_s3 + $0x78] sm:$0xff] }
  0x38   :  { %vm255_vm3 = vcmp.eq.s32.totalorder %v1588_v38, %v1344_v23  ;;  %vm323_vm4 = vcmp.eq.s32.totalorder %v1588_v38, %v1346_v24  ;;  %v372_v11 = vadd.f32 %v1084_v45, %v304_v5  ;;  %v167_v12 = vadd.f32 %v1035_v8, %v1019_v6 }
  0x39   :  { %v577_v10 = vadd.f32 %v1133_v61, %v509_v3  ;;  %v1051_v13 = vsel %vm187_vm2, 1.0, %v1270_v30  ;;  %v1116_v14 = vsel %vm460_vm14, 1.0, %v1270_v30  ;;  %v1132_v15 = vsel %vm528_vm15, 1.0, %v1270_v30 }
  0x3a   :  { %v1067_v16 = vsel %vm255_vm3, 1.0, %v1270_v30  ;;  %vm391_vm5 = vcmp.eq.s32.totalorder %v1588_v38, %v1348_v25  ;;  %v440_v22 = vadd.f32 %v1100_v2, %v372_v11  ;;  %v235_v27 = vadd.f32 %v1051_v13, %v167_v12 }
  0x3b   :  { %1185 = vmatprep.subr.mxu0 %v577_v10  ;;  %1235 = vmatprep.subr.mxu1 %v577_v10  ;;  %v1083_v48 = vsel %vm323_vm4, 1.0, %v1270_v30  ;;  %vm459_vm6 = vcmp.eq.s32.totalorder %v1588_v38, %v1350_v26  ;;  %v1099_v29 = vsel %vm391_vm5, 1.0, %v1270_v30  ;;  %vm527_vm7 = vcmp.eq.s32.totalorder %v1588_v38, %v1358_v28 }
  0x3c   :  { %1186 = vmatpush3.msra.mxu0 %v577_v10  ;;  %1251 = vmatpush3.msra.mxu1 %v577_v10  ;;  %vm50_vm8 = vcmp.eq.s32.totalorder %v1653_v7, %v1337_v19  ;;  %vm118_vm9 = vcmp.eq.s32.totalorder %v1653_v7, %v1339_v20  ;;  %v508_v53 = vadd.f32 %v1116_v14, %v440_v22  ;;  %v1692_v33 = vadd.s32 40, %v1307_v4 }
  0x3d   :  { %v303_v31 = vadd.f32 %v1067_v16, %v235_v27  ;;  %v1018_v32 = vsel %vm50_vm8, 1.0, %v1270_v30  ;;  %688 = vperm.xlu0 %1263, %v614_v17   ;;  %935 = vperm.xlu1 %1264, %v869_v18   ;;  %v1034_v34 = vsel %vm118_vm9, 1.0, %v1270_v30  ;;  %vm186_vm10 = vcmp.eq.s32.totalorder %v1653_v7, %v1341_v21  ;;  %v990_v18 = vld [vmem:[#allocation2] sm:$0x1] }
  0x3e   :  { %vm254_vm11 = vcmp.eq.s32.totalorder %v1653_v7, %v1344_v23  ;;  %vm322_vm12 = vcmp.eq.s32.totalorder %v1653_v7, %v1346_v24  ;;  %v576_v35 = vadd.f32 %v1132_v15, %v508_v53  ;;  %v166_v37 = vadd.f32 %v1034_v34, %v1018_v32 }
  0x3f   :  { %v371_v36 = vadd.f32 %v1083_v48, %v303_v31  ;;  %v1050_v39 = vsel %vm186_vm10, 1.0, %v1270_v30  ;;  %v1115_v41 = vsel %vm459_vm6, 1.0, %v1270_v30  ;;  %v1131_v42 = vsel %vm527_vm7, 1.0, %v1270_v30 }
  0x40   :  { %v1066_v43 = vsel %vm254_vm11, 1.0, %v1270_v30  ;;  %vm390_vm13 = vcmp.eq.s32.totalorder %v1653_v7, %v1348_v25  ;;  %1187 = vmatprep.subr.mxu0 %v576_v35  ;;  %1236 = vmatprep.subr.mxu1 %v576_v35  ;;  %v234_v57 = vadd.f32 %v1050_v39, %v166_v37  ;;  %v1082_v38 = vsel %vm322_vm12, 1.0, %v1270_v30 }
  0x41   :  { %v439_v47 = vadd.f32 %v1099_v29, %v371_v36  ;;  %vm458_vm14 = vcmp.eq.s32.totalorder %v1653_v7, %v1350_v26  ;;  %1188 = vmatpush3.msra.mxu0 %v576_v35  ;;  %1252 = vmatpush3.msra.mxu1 %v576_v35  ;;  %v1098_v49 = vsel %vm390_vm13, 1.0, %v1270_v30  ;;  %vm526_vm15 = vcmp.eq.s32.totalorder %v1653_v7, %v1358_v28 }
  0x42   :  { %vm49_vm0 = vcmp.eq.s32.totalorder %v1692_v33, %v1337_v19  ;;  %vm117_vm1 = vcmp.eq.s32.totalorder %v1692_v33, %v1339_v20  ;;  %v302_v51 = vadd.f32 %v1066_v43, %v234_v57  ;;  %v1731_v54 = vadd.s32 32, %v1307_v4  ;;  %693 = vperm.xlu0 %1263, %v615_v46   ;;  %940 = vperm.xlu1 %1264, %v870_v44  }
  0x43   :  { %v507_v50 = vadd.f32 %v1115_v41, %v439_v47  ;;  %v1017_v52 = vsel %vm49_vm0, 1.0, %v1270_v30  ;;  %v1033_v55 = vsel %vm117_vm1, 1.0, %v1270_v30  ;;  %vm185_vm2 = vcmp.eq.s32.totalorder %v1692_v33, %v1341_v21 }
  0x44   :  { %vm253_vm3 = vcmp.eq.s32.totalorder %v1692_v33, %v1344_v23  ;;  %vm321_vm4 = vcmp.eq.s32.totalorder %v1692_v33, %v1346_v24  ;;  %v370_v58 = vadd.f32 %v1082_v38, %v302_v51  ;;  %v165_v59 = vadd.f32 %v1033_v55, %v1017_v52 }
  0x45   :  { %v575_v56 = vadd.f32 %v1131_v42, %v507_v50  ;;  %v1049_v60 = vsel %vm185_vm2, 1.0, %v1270_v30  ;;  %v1114_v61 = vsel %vm458_vm14, 1.0, %v1270_v30  ;;  %v1130_v62 = vsel %vm526_vm15, 1.0, %v1270_v30 }
  0x46   :  { %v1065_v63 = vsel %vm253_vm3, 1.0, %v1270_v30  ;;  %vm389_vm5 = vcmp.eq.s32.totalorder %v1692_v33, %v1348_v25  ;;  %v438_v40 = vadd.f32 %v1098_v49, %v370_v58  ;;  %v233_v45 = vadd.f32 %v1049_v60, %v165_v59  ;;  %945 = vperm.xlu0 %1263, %v871_v0   ;;  %950 = vperm.xlu1 %1264, %v872_v1  }
  0x47   :  { %1189 = vmatprep.subr.mxu0 %v575_v56  ;;  %1237 = vmatprep.subr.mxu1 %v575_v56  ;;  %v1081_v2 = vsel %vm321_vm4, 1.0, %v1270_v30  ;;  %vm457_vm6 = vcmp.eq.s32.totalorder %v1692_v33, %v1350_v26  ;;  %v1097_v3 = vsel %vm389_vm5, 1.0, %v1270_v30  ;;  %vm525_vm7 = vcmp.eq.s32.totalorder %v1692_v33, %v1358_v28 }
  0x48   :  { %1190 = vmatpush3.msra.mxu0 %v575_v56  ;;  %1253 = vmatpush3.msra.mxu1 %v575_v56  ;;  %vm48_vm8 = vcmp.eq.s32.totalorder %v1731_v54, %v1337_v19  ;;  %vm116_vm9 = vcmp.eq.s32.totalorder %v1731_v54, %v1339_v20  ;;  %v506_v5 = vadd.f32 %v1114_v61, %v438_v40  ;;  %v1770_v8 = vadd.s32 24, %v1307_v4 }
  0x49   :  { %v301_v6 = vadd.f32 %v1065_v63, %v233_v45  ;;  %v1016_v7 = vsel %vm48_vm8, 1.0, %v1270_v30  ;;  %v1032_v10 = vsel %vm116_vm9, 1.0, %v1270_v30  ;;  %vm184_vm10 = vcmp.eq.s32.totalorder %v1731_v54, %v1341_v21 }
  0x4a   :  { %vm252_vm11 = vcmp.eq.s32.totalorder %v1731_v54, %v1344_v23  ;;  %vm320_vm12 = vcmp.eq.s32.totalorder %v1731_v54, %v1346_v24  ;;  %v574_v11 = vadd.f32 %v1130_v62, %v506_v5  ;;  %v164_v13 = vadd.f32 %v1032_v10, %v1016_v7  ;;  %993 = vperm.xlu0 %1263, %v990_v18  }
  0x4b   :  { %v369_v12 = vadd.f32 %v1081_v2, %v301_v6  ;;  %v1048_v14 = vsel %vm184_vm10, 1.0, %v1270_v30  ;;  %v1113_v15 = vsel %vm457_vm6, 1.0, %v1270_v30  ;;  %v1129_v16 = vsel %vm525_vm7, 1.0, %v1270_v30 }
  0x4c   :  { %v1064_v17 = vsel %vm252_vm11, 1.0, %v1270_v30  ;;  %vm388_vm13 = vcmp.eq.s32.totalorder %v1731_v54, %v1348_v25  ;;  %1191 = vmatprep.subr.mxu0 %v574_v11  ;;  %1238 = vmatprep.subr.mxu1 %v574_v11  ;;  %v232_v27 = vadd.f32 %v1048_v14, %v164_v13  ;;  %v1080_v48 = vsel %vm320_vm12, 1.0, %v1270_v30 }
  0x4d   :  { %v437_v22 = vadd.f32 %v1097_v3, %v369_v12  ;;  %vm456_vm14 = vcmp.eq.s32.totalorder %v1731_v54, %v1350_v26  ;;  %1192 = vmatpush3.msra.mxu0 %v574_v11  ;;  %1254 = vmatpush3.msra.mxu1 %v574_v11  ;;  %v1096_v29 = vsel %vm388_vm13, 1.0, %v1270_v30  ;;  %vm524_vm15 = vcmp.eq.s32.totalorder %v1731_v54, %v1358_v28 }
  0x4e   :  { %vm47_vm0 = vcmp.eq.s32.totalorder %v1770_v8, %v1337_v19  ;;  %vm115_vm1 = vcmp.eq.s32.totalorder %v1770_v8, %v1339_v20  ;;  %v300_v31 = vadd.f32 %v1064_v17, %v232_v27  ;;  %v1803_v33 = vadd.s32 16, %v1307_v4 }
  0x4f   :  { %v505_v53 = vadd.f32 %v1113_v15, %v437_v22  ;;  %v1015_v32 = vsel %vm47_vm0, 1.0, %v1270_v30  ;;  %v1031_v34 = vsel %vm115_vm1, 1.0, %v1270_v30  ;;  %vm183_vm2 = vcmp.eq.s32.totalorder %v1770_v8, %v1341_v21 }
  0x50   :  { %vm251_vm3 = vcmp.eq.s32.totalorder %v1770_v8, %v1344_v23  ;;  %vm319_vm4 = vcmp.eq.s32.totalorder %v1770_v8, %v1346_v24  ;;  %v368_v36 = vadd.f32 %v1080_v48, %v300_v31  ;;  %v163_v37 = vadd.f32 %v1031_v34, %v1015_v32 }
  0x51   :  { %v573_v35 = vadd.f32 %v1129_v16, %v505_v53  ;;  %v1047_v39 = vsel %vm183_vm2, 1.0, %v1270_v30  ;;  %v1112_v41 = vsel %vm456_vm14, 1.0, %v1270_v30  ;;  %v1128_v42 = vsel %vm524_vm15, 1.0, %v1270_v30 }
  0x52   :  { %v1063_v43 = vsel %vm251_vm3, 1.0, %v1270_v30  ;;  %vm387_vm5 = vcmp.eq.s32.totalorder %v1770_v8, %v1348_v25  ;;  %v436_v46 = vadd.f32 %v1096_v29, %v368_v36  ;;  %v231_v44 = vadd.f32 %v1047_v39, %v163_v37 }
  0x53   :  { %1193 = vmatprep.subr.mxu0 %v573_v35  ;;  %1239 = vmatprep.subr.mxu1 %v573_v35  ;;  %v1079_v47 = vsel %vm319_vm4, 1.0, %v1270_v30  ;;  %vm455_vm6 = vcmp.eq.s32.totalorder %v1770_v8, %v1350_v26  ;;  %v1095_v57 = vsel %vm387_vm5, 1.0, %v1270_v30  ;;  %vm523_vm7 = vcmp.eq.s32.totalorder %v1770_v8, %v1358_v28 }
  0x54   :  { %1194 = vmatpush3.msra.mxu0 %v573_v35  ;;  %1255 = vmatpush3.msra.mxu1 %v573_v35  ;;  %vm46_vm8 = vcmp.eq.s32.totalorder %v1803_v33, %v1337_v19  ;;  %vm114_vm9 = vcmp.eq.s32.totalorder %v1803_v33, %v1339_v20  ;;  %v504_v38 = vadd.f32 %v1112_v41, %v436_v46  ;;  %v1836_v51 = vadd.s32 8, %v1307_v4  ;;  %v593_v46 = vld [vmem:[%s1969_s1 + $0x48] sm:$0xff] }
  0x55   :  { %v299_v49 = vadd.f32 %v1063_v43, %v231_v44  ;;  %v1014_v50 = vsel %vm46_vm8, 1.0, %v1270_v30  ;;  %v1030_v52 = vsel %vm114_vm9, 1.0, %v1270_v30  ;;  %vm182_vm10 = vcmp.eq.s32.totalorder %v1803_v33, %v1341_v21  ;;  %v587_v44 = vld [vmem:[%s1969_s1 + $0x18] sm:$0xff] }
  0x56   :  { %vm250_vm11 = vcmp.eq.s32.totalorder %v1803_v33, %v1344_v23  ;;  %vm318_vm12 = vcmp.eq.s32.totalorder %v1803_v33, %v1346_v24  ;;  %v572_v54 = vadd.f32 %v1128_v42, %v504_v38  ;;  %v162_v56 = vadd.f32 %v1030_v52, %v1014_v50  ;;  %v596_v38 = vld [vmem:[%s1969_s1 + $0x60] sm:$0xff]  ;;  %v597_v50 = vld [vmem:[%s1969_s1 + $0x68] sm:$0xff]  ;;  %v598_v52 = vld [vmem:[%s1969_s1 + $0x70] sm:$0xff] }
  0x57   :  { %v367_v55 = vadd.f32 %v1079_v47, %v299_v49  ;;  %v1046_v58 = vsel %vm182_vm10, 1.0, %v1270_v30  ;;  %v1111_v59 = vsel %vm455_vm6, 1.0, %v1270_v30  ;;  %v1062_v60 = vsel %vm250_vm11, 1.0, %v1270_v30  ;;  %v595_v47 = vld [vmem:[%s1969_s1 + $0x58] sm:$0xff]  ;;  %v589_v49 = vld [vmem:[%s1969_s1 + $0x28] sm:$0xff] }
  0x58   :  { %vm386_vm13 = vcmp.eq.s32.totalorder %v1803_v33, %v1348_v25  ;;  %1195 = vmatprep.subr.mxu0 %v572_v54  ;;  %1240 = vmatprep.subr.mxu1 %v572_v54  ;;  %v1127_v62 = vsel %vm523_vm7, 1.0, %v1270_v30  ;;  %v230_v63 = vadd.f32 %v1046_v58, %v162_v56  ;;  %v1078_v0 = vsel %vm318_vm12, 1.0, %v1270_v30 }
  0x59   :  { %v435_v61 = vadd.f32 %v1095_v57, %v367_v55  ;;  %1196 = vmatpush3.msra.mxu0 %v572_v54  ;;  %1256 = vmatpush3.msra.mxu1 %v572_v54  ;;  %v1094_v1 = vsel %vm386_vm13, 1.0, %v1270_v30  ;;  %vm454_vm14 = vcmp.eq.s32.totalorder %v1803_v33, %v1350_v26  ;;  %vm45_vm15 = vcmp.eq.s32.totalorder %v1836_v51, %v1337_v19  ;;  %v588_v57 = vld [vmem:[%s1969_s1 + $0x20] sm:$0xff]  ;;  %v591_v54 = vld [vmem:[%s1969_s1 + $0x38] sm:$0xff] }
  0x5a   :  { %vm113_vm0 = vcmp.eq.s32.totalorder %v1836_v51, %v1339_v20  ;;  %v298_v45 = vadd.f32 %v1062_v60, %v230_v63  ;;  %vm522_vm1 = vcmp.eq.s32.totalorder %v1803_v33, %v1358_v28  ;;  %v1013_v2 = vsel %vm45_vm15, 1.0, %v1270_v30  ;;  %v599_v55 = vld [vmem:[%s1969_s1 + $0x78] sm:$0xff] }
  0x5b   :  { %v503_v40 = vadd.f32 %v1111_v59, %v435_v61  ;;  %v1029_v3 = vsel %vm113_vm0, 1.0, %v1270_v30  ;;  %vm181_vm2 = vcmp.eq.s32.totalorder %v1836_v51, %v1341_v21  ;;  %vm249_vm3 = vcmp.eq.s32.totalorder %v1836_v51, %v1344_v23 }
  0x5c   :  { %vm317_vm4 = vcmp.eq.s32.totalorder %v1836_v51, %v1346_v24  ;;  %v366_v6 = vadd.f32 %v1078_v0, %v298_v45  ;;  %v161_v7 = vadd.f32 %v1029_v3, %v1013_v2  ;;  %v1045_v8 = vsel %vm181_vm2, 1.0, %v1270_v30 }
  0x5d   :  { %v571_v5 = vadd.f32 %v1127_v62, %v503_v40  ;;  %v1110_v10 = vsel %vm454_vm14, 1.0, %v1270_v30  ;;  %v1061_v11 = vsel %vm249_vm3, 1.0, %v1270_v30  ;;  %vm385_vm5 = vcmp.eq.s32.totalorder %v1836_v51, %v1348_v25 }
  0x5e   :  { %v434_v12 = vadd.f32 %v1094_v1, %v366_v6  ;;  %v1126_v13 = vsel %vm522_vm1, 1.0, %v1270_v30  ;;  %v229_v14 = vadd.f32 %v1045_v8, %v161_v7  ;;  %v1077_v15 = vsel %vm317_vm4, 1.0, %v1270_v30 }
  0x5f   :  { %1197 = vmatprep.subr.mxu0 %v571_v5  ;;  %1241 = vmatprep.subr.mxu1 %v571_v5  ;;  %v1093_v16 = vsel %vm385_vm5, 1.0, %v1270_v30  ;;  %vm453_vm6 = vcmp.eq.s32.totalorder %v1836_v51, %v1350_v26  ;;  %vm44_vm7 = vcmp.eq.s32.totalorder %v1307_v4, %v1337_v19  ;;  %vm112_vm8 = vcmp.eq.s32.totalorder %v1307_v4, %v1339_v20 }
  0x60   :  { %1198 = vmatpush3.msra.mxu0 %v571_v5  ;;  %1257 = vmatpush3.msra.mxu1 %v571_v5  ;;  %v502_v17 = vadd.f32 %v1110_v10, %v434_v12  ;;  %v297_v18 = vadd.f32 %v1061_v11, %v229_v14  ;;  %vm521_vm9 = vcmp.eq.s32.totalorder %v1836_v51, %v1358_v28  ;;  %v1012_v22 = vsel %vm44_vm7, 1.0, %v1270_v30  ;;  %v590_v51 = vld [vmem:[%s1969_s1 + $0x30] sm:$0xff] }
  0x61   :  { %v1028_v27 = vsel %vm112_vm8, 1.0, %v1270_v30  ;;  %vm180_vm10 = vcmp.eq.s32.totalorder %v1307_v4, %v1341_v21  ;;  %vm248_vm11 = vcmp.eq.s32.totalorder %v1307_v4, %v1344_v23  ;;  %vm316_vm12 = vcmp.eq.s32.totalorder %v1307_v4, %v1346_v24 }
  0x62   :  { %v570_v19 = vadd.f32 %v1126_v13, %v502_v17  ;;  %v365_v20 = vadd.f32 %v1077_v15, %v297_v18  ;;  %v160_v48 = vadd.f32 %v1028_v27, %v1012_v22  ;;  %v1044_v29 = vsel %vm180_vm10, 1.0, %v1270_v30 }
  0x63   :  { %v1109_v53 = vsel %vm453_vm6, 1.0, %v1270_v30  ;;  %v1060_v31 = vsel %vm248_vm11, 1.0, %v1270_v30  ;;  %vm384_vm13 = vcmp.eq.s32.totalorder %v1307_v4, %v1348_v25  ;;  %v1125_v21 = vsel %vm521_vm9, 1.0, %v1270_v30 }
  0x64   :  { %1199 = vmatprep.subr.mxu0 %v570_v19  ;;  %1242 = vmatprep.subr.mxu1 %v570_v19  ;;  %v433_v32 = vadd.f32 %v1093_v16, %v365_v20  ;;  %v228_v33 = vadd.f32 %v1044_v29, %v160_v48  ;;  %v1076_v23 = vsel %vm316_vm12, 1.0, %v1270_v30  ;;  %vm452_vm14 = vcmp.eq.s32.totalorder %v1307_v4, %v1350_v26  ;;  %v585_v26 = vld [vmem:[%s1969_s1 + $0x8] sm:$0xff] }
  0x65   :  { %1200 = vmatpush3.msra.mxu0 %v570_v19  ;;  %1258 = vmatpush3.msra.mxu1 %v570_v19  ;;  %v1092_v35 = vsel %vm384_vm13, 1.0, %v1270_v30  ;;  %vm520_vm15 = vcmp.eq.s32.totalorder %v1307_v4, %v1358_v28  ;;  %v1108_v25 = vsel %vm452_vm14, 1.0, %v1270_v30  ;;  %v586_v28 = vld [vmem:[%s1969_s1 + $0x10] sm:$0xff] }
  0x66   :  { %v501_v24 = vadd.f32 %v1109_v53, %v433_v32  ;;  %v296_v34 = vadd.f32 %v1060_v31, %v228_v33  ;;  %v1124_v41 = vsel %vm520_vm15, 1.0, %v1270_v30  ;;  %v594_v30 = vld [vmem:[%s1969_s1 + $0x50] sm:$0xff] }
  0x68   :  { %v569_v36 = vadd.f32 %v1125_v21, %v501_v24  ;;  %v364_v37 = vadd.f32 %v1076_v23, %v296_v34 }
  0x6a   :  { %1201 = vmatprep.subr.mxu0 %v569_v36  ;;  %1243 = vmatprep.subr.mxu1 %v569_v36  ;;  %v432_v39 = vadd.f32 %v1092_v35, %v364_v37 }
  0x6b   :  { %1202 = vmatpush3.msra.mxu0 %v569_v36  ;;  %1259 = vmatpush3.msra.mxu1 %v569_v36 }
  0x6c   :  { %v500_v42 = vadd.f32 %v1108_v25, %v432_v39 }
  0x6e   :  { %v568_v43 = vadd.f32 %v1124_v41, %v500_v42 }
  0x70   :  { %1203 = vmatprep.subr.mxu0 %v568_v43  ;;  %1244 = vmatprep.subr.mxu1 %v568_v43 }
  0x71   :  { %1204 = vmatpush3.msra.mxu0 %v568_v43  ;;  %1260 = vmatpush3.msra.mxu1 %v568_v43 }
  0x72   :  { %1206 = vmatmul.mubr.f32.vlgmr.msra.gmra.mxu0 %v585_v26  ;;  %1218 = vmatmul.mubr.f32.vlgmr.msra.gmra.mxu1 %v593_v46 }
  0x73   :  { %1208 = vmatprep.mubr.f32.mxu0 %v586_v28  ;;  %1220 = vmatprep.mubr.f32.mxu1 %v594_v30 }
  0x76   :  { %1209 = vmatmul.mubr.f32.gmra.mxu0 %v587_v44  ;;  %1221 = vmatmul.mubr.f32.gmra.mxu1 %v595_v47 }
  0x77   :  { %1211 = vmatprep.mubr.f32.mxu0 %v588_v57  ;;  %1223 = vmatprep.mubr.f32.mxu1 %v596_v38 }
  0x7a   :  { %1212 = vmatmul.mubr.f32.gmra.mxu0 %v589_v49  ;;  %1224 = vmatmul.mubr.f32.gmra.mxu1 %v597_v50 }
  0x7b   :  { %1214 = vmatprep.mubr.f32.mxu0 %v590_v51  ;;  %1226 = vmatprep.mubr.f32.mxu1 %v598_v52 }
  0x7d   :  { %v619_v56 = vpop.permute.xlu0 %618  ;;  %v629_v58 = vpop.permute.xlu1 %628 }
  0x7e   :  { %1215 = vmatmul.mubr.f32.gmra.mxu0 %v591_v54  ;;  %1227 = vmatmul.mubr.f32.gmra.mxu1 %v599_v55 }
  0x81   :  { %v624_v59 = vpop.permute.xlu0 %623  ;;  %v634_v60 = vpop.permute.xlu1 %633 }
  0x85   :  { %v876_v61 = vpop.permute.xlu0 %875  ;;  %v881_v62 = vpop.permute.xlu1 %880 }
  0x89   :  { %v639_v63 = vpop.permute.xlu0 %638 }
  0x8a   :  { %v886_v0 = vpop.permute.xlu1 %885 }
  0x8d   :  { %v644_v1 = vpop.permute.xlu0 %643 }
  0x8e   :  { %v891_v40 = vpop.permute.xlu1 %890 }
  0x91   :  { %v649_v45 = vpop.permute.xlu0 %648 }
  0x92   :  { %v896_v2 = vpop.permute.xlu1 %895 }
  0x95   :  { %v654_v3 = vpop.permute.xlu0 %653 }
  0x96   :  { %v901_v5 = vpop.permute.xlu1 %900 }
  0x9b   :  { %v659_v6 = vpop.permute.xlu0 %658  ;;  %v906_v7 = vpop.permute.xlu1 %905 }
  0xa0   :  { %v664_v8 = vpop.permute.xlu0 %663  ;;  %v911_v10 = vpop.permute.xlu1 %910 }
  0xa6   :  { %v669_v11 = vpop.permute.xlu0 %668  ;;  %v916_v12 = vpop.permute.xlu1 %915 }
  0xaa   :  { %v674_v18 = vpop.permute.xlu0 %673  ;;  %v921_v20 = vpop.permute.xlu1 %920 }
  0xae   :  { %v679_v37 = vpop.permute.xlu0 %678  ;;  %v926_v39 = vpop.permute.xlu1 %925 }
  0xb2   :  { %v684_v54 = vpop.permute.xlu0 %683 }
 0x132   :  { %v1207_v13 = vpop.f32.mrf.mxu0  ;;  %v1219_v14 = vpop.f32.mrf.mxu1 }
 0x133   :  { %v768_v15 = vadd.f32 %v1207_v13, %v624_v59  ;;  %v808_v55 = vadd.f32 %v1219_v14, %v664_v8 }
 0x134   :  { %v762_v16 = vpop.f32.mrf.mxu0  ;;  %v802_v17 = vpop.f32.mrf.mxu1 }
 0x135   :  { %v763_v22 = vadd.f32 %v762_v16, %v619_v56  ;;  %v842_v48 = vmax.f32 %v768_v15, 0.0  ;;  %v803_v49 = vadd.f32 %v802_v17, %v659_v6  ;;  %v850_v15 = vmax.f32 %v808_v55, 0.0 }
 0x136   :  { %v1210_v27 = vpop.f32.mrf.mxu0  ;;  %v1222_v19 = vpop.f32.mrf.mxu1 }
 0x137   :  { %v841_v29 = vmax.f32 %v763_v22, 0.0  ;;  %v778_v53 = vadd.f32 %v1210_v27, %v634_v60  ;;  %v954_v34 = vmul.f32 %v881_v62, %v842_v48  ;;  %v931_v62 = vpop.permute.xlu1 %930  ;;  %v962_v27 = vmul.f32 %v921_v20, %v850_v15 }
 0x138   :  { %v772_v31 = vpop.f32.mrf.mxu0  ;;  %v812_v23 = vpop.f32.mrf.mxu1 }
 0x139   :  { %v953_v32 = vmul.f32 %v876_v61, %v841_v29  ;;  %v773_v33 = vadd.f32 %v772_v31, %v629_v58  ;;  %v844_v21 = vmax.f32 %v778_v53, 0.0 }
 0x13a   :  { %v1213_v24 = vpop.f32.mrf.mxu0  ;;  %v1225_v46 = vpop.f32.mrf.mxu1 }
 0x13b   :  { %v843_v35 = vmax.f32 %v773_v33, 0.0  ;;  %v788_v36 = vadd.f32 %v1213_v24, %v644_v1  ;;  %v969_v41 = vadd.f32 %v954_v34, %v953_v32  ;;  %v956_v26 = vmul.f32 %v891_v40, %v844_v21  ;;  %v936_v14 = vpop.permute.xlu1 %935 }
 0x13c   :  { %v782_v25 = vpop.f32.mrf.mxu0  ;;  %v822_v56 = vpop.f32.mrf.mxu1  ;;  %v828_v29 = vadd.f32 %v1225_v46, %v684_v54 }
 0x13d   :  { %v955_v42 = vmul.f32 %v886_v0, %v843_v35  ;;  %v783_v43 = vadd.f32 %v782_v25, %v639_v63  ;;  %v846_v44 = vmax.f32 %v788_v36, 0.0  ;;  %v849_v63 = vmax.f32 %v803_v49, 0.0 }
 0x13e   :  { %v1216_v28 = vpop.f32.mrf.mxu0  ;;  %v813_v0 = vadd.f32 %v812_v23, %v669_v11  ;;  %v1228_v13 = vpop.f32.mrf.mxu1  ;;  %v823_v22 = vadd.f32 %v822_v56, %v679_v37 }
 0x13f   :  { %v970_v30 = vadd.f32 %v969_v41, %v955_v42  ;;  %v845_v47 = vmax.f32 %v783_v43, 0.0  ;;  %v798_v57 = vadd.f32 %v1216_v28, %v654_v3  ;;  %v958_v58 = vmul.f32 %v901_v5, %v846_v44  ;;  %v941_v23 = vpop.permute.xlu1 %940 }
 0x140   :  { %v792_v38 = vpop.f32.mrf.mxu0  ;;  %v818_v3 = vadd.f32 %v1222_v19, %v674_v18  ;;  %v961_v17 = vmul.f32 %v916_v12, %v849_v63  ;;  %v832_v5 = vpop.f32.mrf.mxu1  ;;  %v853_v11 = vmax.f32 %v823_v22, 0.0  ;;  %v854_v18 = vmax.f32 %v828_v29, 0.0 }
 0x141   :  { %v957_v50 = vmul.f32 %v896_v2, %v845_v47  ;;  %v971_v51 = vadd.f32 %v970_v30, %v956_v26  ;;  %v793_v52 = vadd.f32 %v792_v38, %v649_v45  ;;  %v848_v60 = vmax.f32 %v798_v57, 0.0  ;;  %v689_v2 = vpop.permute.xlu0 %688 }
 0x142   :  { %v851_v45 = vmax.f32 %v813_v0, 0.0  ;;  %v852_v48 = vmax.f32 %v818_v3, 0.0  ;;  %v833_v32 = vadd.f32 %v832_v5, %v689_v2  ;;  %v965_v12 = vmul.f32 %v936_v14, %v853_v11 }
 0x143   :  { %v972_v59 = vadd.f32 %v971_v51, %v957_v50  ;;  %v847_v61 = vmax.f32 %v793_v52, 0.0  ;;  %v960_v16 = vmul.f32 %v911_v10, %v848_v60  ;;  %v966_v35 = vmul.f32 %v941_v23, %v854_v18  ;;  %v951_v42 = vpop.permute.xlu1 %950 }
 0x144   :  { %v963_v31 = vmul.f32 %v926_v39, %v851_v45  ;;  %v964_v21 = vmul.f32 %v931_v62, %v852_v48  ;;  %v855_v24 = vmax.f32 %v833_v32, 0.0 }
 0x145   :  { %v959_v1 = vmul.f32 %v906_v7, %v847_v61  ;;  %v973_v40 = vadd.f32 %v972_v59, %v958_v58  ;;  %v694_v33 = vpop.permute.xlu0 %693 }
 0x146   :  { %v838_v10 = vadd.f32 %v1228_v13, %v694_v33 }
 0x147   :  { %v974_v6 = vadd.f32 %v973_v40, %v959_v1 }
 0x148   :  { %v856_v36 = vmax.f32 %v838_v10, 0.0 }
 0x149   :  { %v975_v8 = vadd.f32 %v974_v6, %v960_v16  ;;  %v946_v20 = vpop.permute.xlu0 %945 }
 0x14a   :  { %v967_v25 = vmul.f32 %v946_v20, %v855_v24  ;;  %v968_v39 = vmul.f32 %v951_v42, %v856_v36 }
 0x14b   :  { %v976_v53 = vadd.f32 %v975_v8, %v961_v17 }
 0x14d   :  { %v977_v7 = vadd.f32 %v976_v53, %v962_v27  ;;  %v994_v47 = vpop.permute.xlu0 %993 }
 0x14e   :  { %v999_v38 = vrot.slane %v994_v47, %v42_v9 }
 0x14f   :  { %v978_v19 = vadd.f32 %v977_v7, %v963_v31 }
 0x151   :  { %v979_v34 = vadd.f32 %v978_v19, %v964_v21 }
 0x153   :  { %v980_v37 = vadd.f32 %v979_v34, %v965_v12 }
 0x155   :  { %v981_v41 = vadd.f32 %v980_v37, %v966_v35 }
 0x157   :  { %v982_v43 = vadd.f32 %v981_v41, %v967_v25 }
 0x159   :  { %v983_v26 = vadd.f32 %v982_v43, %v968_v39 }
 0x15b   :  { %v984_v46 = vrot.slane %v983_v26, 4 }
 0x15d   :  { %v985_v28 = vadd.f32 %v984_v46, %v983_v26 }
 0x15f   :  { %v986_v30 = vrot.slane %v985_v28, 2 }
 0x161   :  { %v987_v44 = vadd.f32 %v986_v30, %v985_v28 }
 0x163   :  { %v988_v57 = vrot.slane %v987_v44, 1 }
 0x165   :  { %v989_v49 = vadd.f32 %v988_v57, %v987_v44 }
 0x167   :  { %v1000_v50 = vadd.f32 %v999_v38, %v989_v49 }
 0x169   :  { %v1140_v51 = vmul.f32 -1.442695, %v1000_v50 }
 0x16b   :  { %1265 = vpow2.f32 %v1140_v51 }
 0x178   :  { %v1266_v52 = vpop.eup %1265 }
 0x179   :  { %v1004_v54 = vadd.f32 1.0, %v1266_v52 }
 0x17b   :  { %1267 = vrcp.f32 %v1004_v54 }
 0x188   :  { %v1268_v55 = vpop.eup %1267 }
 0x189   :  { %1007 = vst [vmem:[%s1971_s5] sm:$0x1] %v1268_v55 }

</bundles_post_ra>
